<compile_context>
chip_gen: v5e
topology: v5e:2x2
jax: 0.10.0
libtpu: 0.0.40
codegen_flags: <defaults>
</compile_context>

<pallas_src>
import functools

import jax
import jax.numpy as jnp
from jax import lax
from jax.experimental import pallas as pl
from jax.experimental.pallas import tpu as pltpu

jax.config.update("jax_default_matmul_precision", "highest")


# ----------------------------------------------------------------------------
# helpers
# ----------------------------------------------------------------------------
def _round_up(x: int, m: int) -> int:
    return (x + m - 1) // m * m


def _largest_tile(dim_p: int, unit: int, cap: int) -> int:
    """Largest multiple of `unit` that divides `dim_p` and is <= cap."""
    best = unit
    m = dim_p // unit
    for d in range(1, max(1, cap // unit) + 1):
        if m % d == 0:
            best = unit * d
    return best


def _vmem_budget_bytes() -> int:
    # Generation-aware scoped-VMEM budget: v5e/v6e have 128 MiB physical VMEM,
    # v7x only 64 MiB.  Keep headroom for Mosaic-internal scratch.
    try:
        cap = int(pltpu.get_tpu_info().vmem_capacity_bytes)
    except Exception:  # not on TPU / API unavailable -> conservative default
        cap = 64 << 20
    if cap >= (100 << 20):
        return 80 << 20     # v5e / v6e
    return 44 << 20         # v7x


def _softplus(z):
    # numerically stable softplus (VPU + EUP)
    return jnp.maximum(z, 0.0) + jnp.log(1.0 + jnp.exp(-jnp.abs(z)))


def _sigmoid(z):
    return 1.0 / (1.0 + jnp.exp(-z))


def _mm_nt(a, b):
    # a: (M, K), b: (N, K) -> (M, N). Contracts last dims so weights stay in
    # their native (out_features, in_features) layout (no wrapper transpose).
    return lax.dot_general(a, b, (((1,), (1,)), ((), ())),
                           preferred_element_type=jnp.float32)


def _mm_nn(a, b):
    # a: (M, K), b: (K, N) -> (M, N).
    if a.shape[1] == 1:     # K == 1: broadcast outer product, skip MXU path
        return a * b
    return lax.dot_general(a, b, (((1,), (0,)), ((), ())),
                           preferred_element_type=jnp.float32)


# ----------------------------------------------------------------------------
# PositiveLinear:  y = x @ clamp(W, 0, 1e10).T
# ----------------------------------------------------------------------------
def _positive_linear_kernel(x_ref, w_ref, o_ref, acc_ref):
    """(tm, tn) output tile accumulated over the K grid axis; W in native layout."""
    k = pl.program_id(2)

    @pl.when(k == 0)
    def _():
        acc_ref[...] = jnp.zeros_like(acc_ref)

    w = jnp.clip(w_ref[...], 0.0, 1.0e10)          # torch.clamp(W, 0, 1e10)
    acc_ref[...] += _mm_nt(x_ref[...], w)

    @pl.when(k == pl.num_programs(2) - 1)
    def _():
        o_ref[...] = acc_ref[...].astype(o_ref.dtype)


def _positive_linear_single_k_kernel(x_ref, w_ref, o_ref):
    """Whole K in one tile: no accumulator scratch / init / extra cast pass."""
    w = jnp.clip(w_ref[...], 0.0, 1.0e10)
    o_ref[...] = _mm_nt(x_ref[...], w).astype(o_ref.dtype)


def _pick_tiles(Bp, Kp, Np, budget):
    tm = _largest_tile(Bp, 8, min(Bp, 512))
    single_m_block = (tm == Bp)
    for tk_cap, tn_cap in ((4096, 1024), (2048, 1024), (2048, 512),
                           (1024, 512), (512, 512), (512, 256),
                           (256, 256), (128, 128)):
        tk = _largest_tile(Kp, 128, tk_cap)
        tn_cap_eff = tn_cap
        # Keep >= 2 blocks on the (parallel) N axis when the M grid collapses
        # to 1, so both v7x TensorCores get work.
        if single_m_block and Np >= 256:
            tn_cap_eff = min(tn_cap, max(128, Np // 2))
        tn = _largest_tile(Np, 128, tn_cap_eff)
        # double-buffered x + W tiles, clamped-W temp, acc + double-buffered out
        need = 4 * (2 * tm * tk + 3 * tn * tk + 3 * tm * tn)
        if need <= budget // 2:
            return tm, tk, tn
    return tm, 128, 128


@jax.jit
def positive_linear(x, weight):
    """y = x @ clamp(weight, 0, 1e10).T   (PositiveLinear.forward)

    x:      (..., in_features) f32
    weight: (out_features, in_features) f32 — native nn.Linear layout, used
            as-is (no transpose / relayout pass in the wrapper).
    """
    orig_shape = x.shape
    K = orig_shape[-1]
    N, Kw = weight.shape
    assert K == Kw

    x2 = x.reshape(-1, K)
    B = x2.shape[0]

    # Pad only to the hardware (8, 128) granule — not to tile multiples.
    Bp, Kp, Np = _round_up(B, 8), _round_up(K, 128), _round_up(N, 128)
    if (Bp, Kp) != (B, K):
        x2 = jnp.pad(x2, ((0, Bp - B), (0, Kp - K)))
    w2 = weight
    if (Np, Kp) != (N, K):
        w2 = jnp.pad(weight, ((0, Np - N), (0, Kp - K)))

    budget = _vmem_budget_bytes()
    tm, tk, tn = _pick_tiles(Bp, Kp, Np, budget)

    cost = pl.CostEstimate(
        flops=2 * Bp * Kp * Np,
        transcendentals=0,
        bytes_accessed=4 * (Bp * Kp + Kp * Np + Bp * Np),
    )

    if tk == Kp:
        grid = (Bp // tm, Np // tn)
        in_specs = [pl.BlockSpec((tm, Kp), lambda i, j: (i, 0)),
                    pl.BlockSpec((tn, Kp), lambda i, j: (j, 0))]
        out_specs = pl.BlockSpec((tm, tn), lambda i, j: (i, j))
        scratch = []
        kernel = _positive_linear_single_k_kernel
        dims = ("parallel", "parallel")
    else:
        grid = (Bp // tm, Np // tn, Kp // tk)
        in_specs = [pl.BlockSpec((tm, tk), lambda i, j, k: (i, k)),
                    pl.BlockSpec((tn, tk), lambda i, j, k: (j, k))]
        out_specs = pl.BlockSpec((tm, tn), lambda i, j, k: (i, j))
        scratch = [pltpu.VMEM((tm, tn), jnp.float32)]
        kernel = _positive_linear_kernel
        dims = ("parallel", "parallel", "arbitrary")

    y = pl.pallas_call(
        kernel,
        out_shape=jax.ShapeDtypeStruct((Bp, Np), x.dtype),
        grid_spec=pltpu.PrefetchScalarGridSpec(
            num_scalar_prefetch=0,
            grid=grid,
            in_specs=in_specs,
            out_specs=out_specs,
            scratch_shapes=scratch,
        ),
        compiler_params=pltpu.CompilerParams(
            dimension_semantics=dims,
            vmem_limit_bytes=budget,
        ),
        cost_estimate=cost,
    )(x2, w2)

    y = y[:B, :N]
    return y.reshape(*orig_shape[:-1], N)


# ----------------------------------------------------------------------------
# Fused BLNN.f1: ICNN forward + analytic input-gradient in ONE pallas_call
# ----------------------------------------------------------------------------
def _make_f1_kernel(num_layers: int, smooth: float):
    inv_smooth = 1.0 / float(smooth)

    def kernel(x_ref, wy0_ref, by0_ref, *rest):
        grad_ref = rest[-1]
        layer_refs = rest[:-1]

        x = x_ref[...]

        # ---- ICNN forward (all activations stay in VMEM / vregs) ----
        z = _mm_nt(x, wy0_ref[...]) + by0_ref[...]
        sigs = [_sigmoid(z)]
        h = _softplus(z)

        wys, wzs = [], []
        for i in range(num_layers):
            wy = layer_refs[3 * i][...]
            by = layer_refs[3 * i + 1][...]
            wz = jnp.clip(layer_refs[3 * i + 2][...], 0.0, 1.0e10)  # PositiveLinear clamp
            z = _mm_nt(h, wz) + _mm_nt(x, wy) + by
            sigs.append(_sigmoid(z))
            h = _softplus(z)
            wys.append(wy)
            wzs.append(wz)

        # ---- analytic backward: d sum(icnn_output) / d x ----
        grad_x = x * inv_smooth                     # from 1/(2*smooth) * ||x||^2
        g = jnp.ones_like(sigs[-1])                 # d sum(h_L) / d h_L
        for i in range(num_layers - 1, -1, -1):
            gz = g * sigs[i + 1]                    # softplus' = sigmoid
            wy, wz = wys[i], wzs[i]
            if wy.shape[0] == 1:                    # final layer: out_features == 1
                grad_x = grad_x + gz * wy
                g = gz * wz
            else:
                grad_x = grad_x + _mm_nn(gz, wy)
                g = _mm_nn(gz, wz)
        gz0 = g * sigs[0]
        grad_x = grad_x + _mm_nn(gz0, wy0_ref[...])

        grad_ref[...] = grad_x.astype(grad_ref.dtype)

    return kernel


def f1_pallas(params, x, smooth):
    """BLNN.f1 (ICNN forward + grad wrt input), whole layer stack fused."""
    num_layers = len(params["Wy"])
    kernel = _make_f1_kernel(num_layers, float(smooth))
    args = [x, params["Wy0"], params["by0"].reshape(1, -1)]
    for wy, by, wz in zip(params["Wy"], params["by"], params["Wz"]):
        args.extend([wy, by.reshape(1, -1), wz])
    return pl.pallas_call(
        kernel,
        out_shape=jax.ShapeDtypeStruct(x.shape, x.dtype),
    )(*args)


# ----------------------------------------------------------------------------
# BLNN.legendre / BLNN.forward (XLA-level fixed-point loop around the kernel)
# ----------------------------------------------------------------------------
def _legendre(f1_fn, z, smooth, convex, max_it, tol):
    step = 2.0 * smooth

    def cond(carry):
        i, _, resid = carry
        return jnp.logical_and(i < max_it, resid >= tol)

    def body(carry):
        i, x1, _ = carry
        grad = f1_fn(x1)
        r = z - grad
        x1_new = x1 + (step / (i + 1.0)) * r
        resid = jnp.mean(jnp.sqrt(jnp.sum(r * r, axis=1)))
        return (i + 1.0, x1_new, resid)

    init = (jnp.float32(0.0), jnp.ones_like(z), jnp.float32(jnp.inf))
    _, x1, _ = lax.while_loop(cond, body, init)
    return x1 + convex * z


@functools.partial(jax.jit, static_argnames=("smooth", "convex", "max_it", "tol"))
def blnn_forward(params, z, *, smooth, convex, max_it=500, tol=1e-3):
    """BLNN.forward: legendre transform via damped fixed-point on the fused f1."""
    return _legendre(lambda x1: f1_pallas(params, x1, smooth),
                     z, smooth, convex, max_it, tol)


# ----------------------------------------------------------------------------
# Pure-JAX references
# ----------------------------------------------------------------------------
def _positive_linear_ref(x, weight):
    return x @ jnp.clip(weight, 0.0, 1.0e10).T


def _f1_ref(params, x, smooth):
    def icnn_sum(xb):
        h = jax.nn.softplus(xb @ params["Wy0"].T + params["by0"])
        for wy, by, wz in zip(params["Wy"], params["by"], params["Wz"]):
            h = jax.nn.softplus(h @ jnp.clip(wz, 0.0, 1.0e10).T + xb @ wy.T + by)
        out = h + (0.5 / smooth) * jnp.sum(xb * xb, axis=1, keepdims=True)
        return jnp.sum(out)
    return jax.grad(icnn_sum)(x)


@functools.partial(jax.jit, static_argnames=("smooth", "convex", "max_it", "tol"))
def _blnn_forward_ref(params, z, *, smooth, convex, max_it=500, tol=1e-3):
    return _legendre(lambda x1: _f1_ref(params, x1, smooth),
                     z, smooth, convex, max_it, tol)


def xavier_normal(key, out_features, in_features, dtype=jnp.float32):
    std = (2.0 / (in_features + out_features)) ** 0.5
    return std * jax.random.normal(key, (out_features, in_features), dtype=dtype)


if __name__ == "__main__":
    key = jax.random.PRNGKey(0)
    keys = jax.random.split(key, 16)

    # --- 1) PositiveLinear at the module's typical tiny h_dim shape ----------
    batch, in_f, out_f = 8, 32, 16
    x = jax.random.normal(keys[0], (batch, in_f), dtype=jnp.float32)
    w = xavier_normal(keys[1], out_f, in_f)
    y = positive_linear(x, w)
    jax.block_until_ready(y)
    assert y.shape == (batch, out_f)
    assert jnp.allclose(y, _positive_linear_ref(x, w), atol=1e-5, rtol=1e-5)

    # --- 2) larger lane-aligned shape: exercises the tiled parallel grid -----
    b2, k2, n2 = 24, 1024, 640
    x_big = jax.random.normal(keys[2], (b2, k2), dtype=jnp.float32)
    w_big = xavier_normal(keys[3], n2, k2)
    y_big = positive_linear(x_big, w_big)
    jax.block_until_ready(y_big)
    assert y_big.shape == (b2, n2)
    assert jnp.allclose(y_big, _positive_linear_ref(x_big, w_big), atol=1e-4, rtol=1e-4)

    # --- 3) fused BLNN f1 (ICNN fwd + analytic grad) and the full forward ----
    contiz_dim, h_dim, num_hidden_layers1 = 8, 32, 2
    smooth, convex = 0.5, 0.1
    bsz = 8

    params = {
        "Wy0": xavier_normal(keys[4], h_dim, contiz_dim),
        "by0": 0.01 * jax.random.normal(keys[5], (h_dim,), dtype=jnp.float32),
        "Wy": [], "by": [], "Wz": [],
    }
    kidx = 6
    for i in range(num_hidden_layers1):
        out_i = h_dim if i < num_hidden_layers1 - 1 else 1
        params["Wy"].append(xavier_normal(keys[kidx], out_i, contiz_dim)); kidx += 1
        params["by"].append(0.01 * jax.random.normal(keys[kidx], (out_i,), dtype=jnp.float32)); kidx += 1
        params["Wz"].append(xavier_normal(keys[kidx], out_i, h_dim)); kidx += 1

    x1_test = jax.random.normal(keys[kidx], (bsz, contiz_dim), dtype=jnp.float32); kidx += 1
    g_pallas = f1_pallas(params, x1_test, smooth)
    jax.block_until_ready(g_pallas)
    g_ref = _f1_ref(params, x1_test, smooth)
    assert g_pallas.shape == (bsz, contiz_dim)
    assert jnp.allclose(g_pallas, g_ref, atol=1e-4, rtol=1e-4)

    z = jax.random.normal(keys[kidx], (bsz, contiz_dim), dtype=jnp.float32)
    out = blnn_forward(params, z, smooth=smooth, convex=convex, max_it=40, tol=0.0)
    jax.block_until_ready(out)
    out_ref = _blnn_forward_ref(params, z, smooth=smooth, convex=convex, max_it=40, tol=0.0)
    assert out.shape == (bsz, contiz_dim)
    assert bool(jnp.all(jnp.isfinite(out)))
    assert jnp.allclose(out, out_ref, atol=5e-3, rtol=1e-3)

    print("KERNEL_OK")
</pallas_src>

<mosaic_0001>
module attributes {stable_mosaic.version = 11 : i64} {
  func.func @_positive_linear_single_k_kernel(%arg0: i32, %arg1: i32, %arg2: memref<8x128xf32, #tpu.memory_space<vmem>>, %arg3: memref<128x128xf32, #tpu.memory_space<vmem>>, %arg4: memref<8x128xf32, #tpu.memory_space<vmem>>) attributes {dimension_semantics = [#tpu.dimension_semantics<parallel>, #tpu.dimension_semantics<parallel>], iteration_bounds = array<i64: 1, 1>, scalar_prefetch = 0 : i64, scratch_operands = 0 : i64, tpu.core_type = #tpu.core_type<tc>, window_params = [{transform_indices = @transform_0, window_bounds = array<i64: 8, 128>}, {transform_indices = @transform_1, window_bounds = array<i64: 128, 128>}, {transform_indices = @transform_2, window_bounds = array<i64: 8, 128>}]} {
    %c0 = arith.constant 0 : index
    %c0_0 = arith.constant 0 : index
    %0 = vector.load %arg3[%c0, %c0_0] : memref<128x128xf32, #tpu.memory_space<vmem>>, vector<128x128xf32>
    %cst = arith.constant 0.000000e+00 : f32
    %cst_1 = arith.constant 1.000000e+10 : f32
    %1 = vector.broadcast %cst : f32 to vector<128x128xf32>
    %2 = arith.maximumf %1, %0 : vector<128x128xf32>
    %3 = vector.broadcast %cst_1 : f32 to vector<128x128xf32>
    %4 = arith.minimumf %3, %2 : vector<128x128xf32>
    %c0_2 = arith.constant 0 : index
    %c0_3 = arith.constant 0 : index
    %5 = vector.load %arg2[%c0_2, %c0_3] : memref<8x128xf32, #tpu.memory_space<vmem>>, vector<8x128xf32>
    %cst_4 = arith.constant dense<0.000000e+00> : vector<8x128xf32>
    %6 = tpu.matmul %5, %4, %cst_4 {dimension_numbers = #tpu.dot_dimension_numbers<[1], [1], [0], [0], [0, 0, 1, 0], [], []>, precision = #tpu.contract_precision<fp32>} : vector<8x128xf32>, vector<128x128xf32>, vector<8x128xf32> -> vector<8x128xf32>
    %c0_5 = arith.constant 0 : index
    %c0_6 = arith.constant 0 : index
    %7 = vector.load %arg4[%c0_5, %c0_6] : memref<8x128xf32, #tpu.memory_space<vmem>>, vector<8x128xf32>
    tpu.vector_store %arg4[%c0_5, %c0_6], %6 {strides = array<i32>} : memref<8x128xf32, #tpu.memory_space<vmem>>, vector<8x128xf32>,
    return
  }
  func.func @transform_0(%arg0: i32, %arg1: i32) -> (i32, i32) {
    %c0_i32 = arith.constant 0 : i32
    %c0_i32_0 = arith.constant 0 : i32
    return %arg0, %c0_i32 : i32, i32
  }
  func.func @transform_1(%arg0: i32, %arg1: i32) -> (i32, i32) {
    %c0_i32 = arith.constant 0 : i32
    %c0_i32_0 = arith.constant 0 : i32
    return %arg1, %c0_i32 : i32, i32
  }
  func.func @transform_2(%arg0: i32, %arg1: i32) -> (i32, i32) {
    %c0_i32 = arith.constant 0 : i32
    return %arg0, %arg1 : i32, i32
  }
}

</mosaic_0001>

<bundles_post_ra>
// kernel: positive_linear.1
= control target key start
LH: loop header
LB: loop body
LE: loop exit
PB: predicated region body
PF: predicated region fallthrough
CT: control target
= control target key end

     0   :  { %s743_s0 = inlined_call_operand.vmem [shape: f32[8,128], index: 0, kind: input, shape index: {}]   ;;  %s744_s1 = inlined_call_operand.vmem [shape: f32[128,128], index: 1, kind: input, shape index: {}]   ;;  %s745_s2 = inlined_call_operand.hbm [shape: f32[8,128], index: 2, kind: output, shape index: {}]  }
   0x1   :  { %v27_v0 = vld [vmem:[%s744_s1 + $0x78] sm:$0xff]  ;;  %v26_v1 = vld [vmem:[%s744_s1 + $0x70] sm:$0xff]  ;;  %v25_v2 = vld [vmem:[%s744_s1 + $0x68] sm:$0xff] }
   0x2   :  { %v43_v3 = vmax.f32 %v27_v0, 0.0  ;;  %v42_v4 = vmax.f32 %v26_v1, 0.0  ;;  %v41_v5 = vmax.f32 %v25_v2, 0.0  ;;  %v24_v6 = vld [vmem:[%s744_s1 + $0x60] sm:$0xff]  ;;  %v23_v7 = vld [vmem:[%s744_s1 + $0x58] sm:$0xff]  ;;  %v22_v10 = vld [vmem:[%s744_s1 + $0x50] sm:$0xff] }
   0x3   :  { %v40_v8 = vmax.f32 %v24_v6, 0.0  ;;  %v39_v9 = vmax.f32 %v23_v7, 0.0  ;;  %v38_v19 = vmax.f32 %v22_v10, 0.0 }
   0x4   :  { %v59_v11 = vmin.f32 %v43_v3, 1e+10  ;;  %v58_v12 = vmin.f32 %v42_v4, 1e+10  ;;  %v57_v13 = vmin.f32 %v41_v5, 1e+10 }
   0x5   :  { %v56_v14 = vmin.f32 %v40_v8, 1e+10  ;;  %v55_v18 = vmin.f32 %v39_v9, 1e+10 }
   0x6   :  { %v480_v15 = vand.u32 4294901760, %v59_v11  ;;  %v482_v16 = vand.u32 4294901760, %v58_v12  ;;  %v484_v17 = vand.u32 4294901760, %v57_v13 }
   0x7   :  { %7 = vsyncpa [#allocation3], 0  ;;  %v493_v22 = vand.u32 4294901760, %v56_v14  ;;  %v21_v24 = vld [vmem:[%s744_s1 + $0x48] sm:$0xff]  ;;  %v505_v27 = vand.u32 4294901760, %v55_v18  ;;  %v20_v34 = vld [vmem:[%s744_s1 + $0x40] sm:$0xff] }
   0x8   :  { %62 = vmatpush.xpose.msra.mxu0 %v480_v15  ;;  %v488_v20 = vsub.f32 %v59_v11, %v480_v15  ;;  %v491_v21 = vsub.f32 %v58_v12, %v482_v16  ;;  %v496_v23 = vsub.f32 %v57_v13, %v484_v17  ;;  %258 = vmatpush.xpose.msra.mxu3 %v480_v15  ;;  %v54_v28 = vmin.f32 %v38_v19, 1e+10  ;;  %v19_v43 = vld [vmem:[%s744_s1 + $0x38] sm:$0xff]  ;;  %v18_v51 = vld [vmem:[%s744_s1 + $0x30] sm:$0xff]  ;;  %v17_v59 = vld [vmem:[%s744_s1 + $0x28] sm:$0xff]  ;;  %s410_s17 = sshll.u32 %s745_s2, 4  ;;  %s411_s17 = int_to_ptr.hbm [resolvable:$true] %s410_s17 }
   0x9   :  { %v37_v29 = vmax.f32 %v21_v24, 0.0  ;;  %v516_v33 = vsub.f32 %v56_v14, %v493_v22  ;;  %v36_v38 = vmax.f32 %v20_v34, 0.0  ;;  %v531_v42 = vsub.f32 %v55_v18, %v505_v27  ;;  %v16_v3 = vld [vmem:[%s744_s1 + $0x20] sm:$0xff]  ;;  %v15_v11 = vld [vmem:[%s744_s1 + $0x18] sm:$0xff] }
   0xa   :  { %v104_v25 = vand.u32 4294901760, %v488_v20  ;;  %v110_v26 = vand.u32 4294901760, %v491_v21  ;;  %205 = vmatpush.xpose.msra.mxu2 %v488_v20  ;;  %v116_v32 = vand.u32 4294901760, %v496_v23  ;;  %v523_v36 = vand.u32 4294901760, %v54_v28 }
   0xb   :  { %v53_v37 = vmin.f32 %v37_v29, 1e+10  ;;  %v122_v41 = vand.u32 4294901760, %v516_v33  ;;  %v52_v46 = vmin.f32 %v36_v38, 1e+10  ;;  %v128_v49 = vand.u32 4294901760, %v531_v42 }
   0xc   :  { %64 = vmatpush.xpose.msra.mxu0 %v482_v16  ;;  %v105_v30 = vsub.f32 %v488_v20, %v104_v25  ;;  %v111_v31 = vsub.f32 %v491_v21, %v110_v26  ;;  %260 = vmatpush.xpose.msra.mxu3 %v482_v16  ;;  %v117_v40 = vsub.f32 %v496_v23, %v116_v32  ;;  %v35_v50 = vmax.f32 %v19_v43, 0.0  ;;  %v14_v29 = vld [vmem:[%s744_s1 + $0x10] sm:$0xff]  ;;  %v60_v20 = vld [vmem:[%s743_s0] sm:$0xff]  ;;  %s446_s0 = smov [#allocation2]  }
   0xd   :  { %v538_v44 = vand.u32 4294901760, %v53_v37  ;;  %v541_v45 = vsub.f32 %v54_v28, %v523_v36  ;;  %v123_v48 = vsub.f32 %v516_v33, %v122_v41  ;;  %v554_v53 = vand.u32 4294901760, %v52_v46  ;;  %s408_s14 = sshll.u32 %s446_s0, 4  ;;  %s409_s14 = int_to_ptr.vmem [resolvable:$true] %s408_s14 }
   0xe   :  { %v106_v35 = vand.u32 4294901760, %v105_v30  ;;  %208 = vmatpush.xpose.msra.mxu2 %v491_v21  ;;  %v112_v39 = vand.u32 4294901760, %v111_v31  ;;  %v118_v47 = vand.u32 4294901760, %v117_v40  ;;  %v129_v56 = vsub.f32 %v531_v42, %v128_v49  ;;  %v13_v40 = vld [vmem:[%s744_s1 + $0x8] sm:$0xff] }
   0xf   :  { %v134_v52 = vand.u32 4294901760, %v541_v45  ;;  %v557_v54 = vsub.f32 %v53_v37, %v538_v44  ;;  %v124_v55 = vand.u32 4294901760, %v123_v48  ;;  %v51_v57 = vmin.f32 %v35_v50, 1e+10 }
  0x10   :  { %107 = vmatpush.xpose.msra.mxu1 %v106_v35  ;;  %66 = vmatpush.xpose.msra.mxu0 %v484_v17  ;;  %v34_v58 = vmax.f32 %v18_v51, 0.0  ;;  %v33_v62 = vmax.f32 %v17_v59, 0.0  ;;  %v130_v63 = vand.u32 4294901760, %v129_v56  ;;  %v576_v1 = vsub.f32 %v52_v46, %v554_v53  ;;  %v12_v56 = vld [vmem:[%s744_s1] sm:$0xff] }
  0x11   :  { %262 = vmatpush.xpose.msra.mxu3 %v484_v17  ;;  %v135_v60 = vsub.f32 %v541_v45, %v134_v52  ;;  %v140_v61 = vand.u32 4294901760, %v557_v54  ;;  %v573_v0 = vand.u32 4294901760, %v51_v57  ;;  %v32_v6 = vmax.f32 %v16_v3, 0.0 }
  0x12   :  { %211 = vmatpush.xpose.msra.mxu2 %v496_v23  ;;  %v50_v2 = vmin.f32 %v34_v58, 1e+10  ;;  %v49_v5 = vmin.f32 %v33_v62, 1e+10  ;;  %v146_v8 = vand.u32 4294901760, %v576_v1  ;;  %v31_v14 = vmax.f32 %v15_v11, 0.0 }
  0x13   :  { %v136_v4 = vand.u32 4294901760, %v135_v60  ;;  %v141_v7 = vsub.f32 %v557_v54, %v140_v61  ;;  %v591_v10 = vsub.f32 %v51_v57, %v573_v0  ;;  %v48_v13 = vmin.f32 %v32_v6, 1e+10 }
  0x14   :  { %113 = vmatpush.xpose.msra.mxu1 %v112_v39  ;;  %68 = vmatpush.xpose.msra.mxu0 %v493_v22  ;;  %v588_v9 = vand.u32 4294901760, %v50_v2  ;;  %v598_v12 = vand.u32 4294901760, %v49_v5  ;;  %v147_v19 = vsub.f32 %v576_v1, %v146_v8  ;;  %v47_v34 = vmin.f32 %v31_v14, 1e+10 }
  0x15   :  { %264 = vmatpush.xpose.msra.mxu3 %v493_v22  ;;  %v142_v18 = vand.u32 4294901760, %v141_v7  ;;  %v152_v24 = vand.u32 4294901760, %v591_v10  ;;  %v613_v30 = vand.u32 4294901760, %v48_v13  ;;  %v30_v39 = vmax.f32 %v14_v29, 0.0 }
  0x16   :  { %214 = vmatpush.xpose.msra.mxu2 %v516_v33  ;;  %v606_v28 = vsub.f32 %v50_v2, %v588_v9  ;;  %v616_v31 = vsub.f32 %v49_v5, %v598_v12  ;;  %v148_v35 = vand.u32 4294901760, %v147_v19  ;;  %v629_v46 = vand.u32 4294901760, %v47_v34 }
  0x17   :  { %v153_v37 = vsub.f32 %v591_v10, %v152_v24  ;;  %v46_v51 = vmin.f32 %v30_v39, 1e+10  ;;  %v28_v2 = vmax.f32 %v12_v56, 0.0  ;;  %v93_v21 = vand.u32 4294901760, %v60_v20 }
  0x18   :  { %119 = vmatpush.xpose.msra.mxu1 %v118_v47  ;;  %70 = vmatpush.xpose.msra.mxu0 %v505_v27  ;;  %v158_v38 = vand.u32 4294901760, %v606_v28  ;;  %v164_v43 = vand.u32 4294901760, %v616_v31  ;;  %v632_v47 = vsub.f32 %v48_v13, %v613_v30  ;;  %v648_v59 = vsub.f32 %v47_v34, %v629_v46 }
  0x19   :  { %266 = vmatpush.xpose.msra.mxu3 %v505_v27  ;;  %v154_v48 = vand.u32 4294901760, %v153_v37  ;;  %v651_v62 = vand.u32 4294901760, %v46_v51  ;;  %v44_v11 = vmin.f32 %v28_v2, 1e+10 }
  0x1a   :  { %217 = vmatpush.xpose.msra.mxu2 %v531_v42  ;;  %v159_v50 = vsub.f32 %v606_v28, %v158_v38  ;;  %v165_v57 = vsub.f32 %v616_v31, %v164_v43  ;;  %v170_v58 = vand.u32 4294901760, %v632_v47 }
  0x1b   :  { %v663_v7 = vsub.f32 %v46_v51, %v651_v62  ;;  %v672_v19 = vand.u32 4294901760, %v44_v11 }
  0x1c   :  { %125 = vmatpush.xpose.msra.mxu1 %v124_v55  ;;  %72 = vmatpush.xpose.msra.mxu0 %v523_v36  ;;  %v29_v55 = vmax.f32 %v13_v40, 0.0  ;;  %v160_v60 = vand.u32 4294901760, %v159_v50  ;;  %v171_v3 = vsub.f32 %v632_v47, %v170_v58  ;;  %v166_v5 = vand.u32 4294901760, %v165_v57 }
  0x1d   :  { %268 = vmatpush.xpose.msra.mxu3 %v523_v36  ;;  %v193_v39 = vsub.f32 %v44_v11, %v672_v19 }
  0x1e   :  { %220 = vmatpush.xpose.msra.mxu2 %v541_v45  ;;  %v172_v13 = vand.u32 4294901760, %v171_v3 }
  0x1f   :  { %v194_v50 = vand.u32 4294901760, %v193_v39 }
  0x20   :  { %131 = vmatpush.xpose.msra.mxu1 %v130_v63  ;;  %74 = vmatpush.xpose.msra.mxu0 %v538_v44  ;;  %v45_v63 = vmin.f32 %v29_v55, 1e+10 }
  0x21   :  { %270 = vmatpush.xpose.msra.mxu3 %v538_v44  ;;  %v195_v55 = vsub.f32 %v193_v39, %v194_v50 }
  0x22   :  { %223 = vmatpush.xpose.msra.mxu2 %v557_v54  ;;  %v660_v6 = vand.u32 4294901760, %v45_v63 }
  0x23   :  { %v196_v56 = vand.u32 4294901760, %v195_v55 }
  0x24   :  { %137 = vmatpush.xpose.msra.mxu1 %v136_v4  ;;  %76 = vmatpush.xpose.msra.mxu0 %v554_v53  ;;  %v176_v4 = vand.u32 4294901760, %v648_v59  ;;  %v675_v29 = vsub.f32 %v45_v63, %v660_v6 }
  0x25   :  { %272 = vmatpush.xpose.msra.mxu3 %v554_v53 }
  0x26   :  { %226 = vmatpush.xpose.msra.mxu2 %v576_v1  ;;  %v177_v14 = vsub.f32 %v648_v59, %v176_v4  ;;  %v188_v37 = vand.u32 4294901760, %v675_v29 }
  0x28   :  { %143 = vmatpush.xpose.msra.mxu1 %v142_v18  ;;  %78 = vmatpush.xpose.msra.mxu0 %v573_v0  ;;  %v182_v18 = vand.u32 4294901760, %v663_v7  ;;  %v178_v34 = vand.u32 4294901760, %v177_v14 }
  0x29   :  { %274 = vmatpush.xpose.msra.mxu3 %v573_v0 }
  0x2a   :  { %229 = vmatpush.xpose.msra.mxu2 %v591_v10 }
  0x2c   :  { %149 = vmatpush.xpose.msra.mxu1 %v148_v35  ;;  %80 = vmatpush.xpose.msra.mxu0 %v588_v9  ;;  %v183_v35 = vsub.f32 %v663_v7, %v182_v18 }
  0x2d   :  { %276 = vmatpush.xpose.msra.mxu3 %v588_v9 }
  0x2e   :  { %232 = vmatpush.xpose.msra.mxu2 %v606_v28  ;;  %v184_v40 = vand.u32 4294901760, %v183_v35 }
  0x30   :  { %155 = vmatpush.xpose.msra.mxu1 %v154_v48  ;;  %82 = vmatpush.xpose.msra.mxu0 %v598_v12  ;;  %v189_v48 = vsub.f32 %v675_v29, %v188_v37 }
  0x31   :  { %278 = vmatpush.xpose.msra.mxu3 %v598_v12 }
  0x32   :  { %235 = vmatpush.xpose.msra.mxu2 %v616_v31  ;;  %v190_v51 = vand.u32 4294901760, %v189_v48 }
  0x34   :  { %161 = vmatpush.xpose.msra.mxu1 %v160_v60  ;;  %84 = vmatpush.xpose.msra.mxu0 %v613_v30 }
  0x35   :  { %280 = vmatpush.xpose.msra.mxu3 %v613_v30 }
  0x36   :  { %238 = vmatpush.xpose.msra.mxu2 %v632_v47 }
  0x38   :  { %167 = vmatpush.xpose.msra.mxu1 %v166_v5  ;;  %86 = vmatpush.xpose.msra.mxu0 %v629_v46 }
  0x39   :  { %282 = vmatpush.xpose.msra.mxu3 %v629_v46 }
  0x3a   :  { %241 = vmatpush.xpose.msra.mxu2 %v648_v59 }
  0x3c   :  { %173 = vmatpush.xpose.msra.mxu1 %v172_v13  ;;  %88 = vmatpush.xpose.msra.mxu0 %v651_v62 }
  0x3d   :  { %284 = vmatpush.xpose.msra.mxu3 %v651_v62 }
  0x3e   :  { %244 = vmatpush.xpose.msra.mxu2 %v663_v7 }
  0x40   :  { %179 = vmatpush.xpose.msra.mxu1 %v178_v34  ;;  %90 = vmatpush.xpose.msra.mxu0 %v660_v6 }
  0x41   :  { %286 = vmatpush.xpose.msra.mxu3 %v660_v6 }
  0x42   :  { %247 = vmatpush.xpose.msra.mxu2 %v675_v29 }
  0x44   :  { %185 = vmatpush.xpose.msra.mxu1 %v184_v40  ;;  %92 = vmatpush.xpose.msra.mxu0 %v672_v19 }
  0x45   :  { %288 = vmatpush.xpose.msra.mxu3 %v672_v19 }
  0x46   :  { %250 = vmatpush.xpose.msra.mxu2 %v193_v39 }
  0x48   :  { %299 = vmatpush.xpose.msrb.mxu0 %v104_v25  ;;  %191 = vmatpush.xpose.msra.mxu1 %v190_v51  ;;  %v94_v25 = vsub.f32 %v60_v20, %v93_v21 }
  0x4a   :  { %253 = vmatmul.f32.vlgmr.msra.gmra.mxu2 %v94_v25 }
  0x4c   :  { %303 = vmatpush.xpose.msrb.mxu0 %v110_v26  ;;  %197 = vmatpush.xpose.msra.mxu1 %v196_v56 }
  0x4f   :  { %199 = vmatmul.f32.vlgmr.msra.gmra.mxu1 %v93_v21 }
  0x50   :  { %366 = vmatpush.xpose.msrb.mxu1 %v480_v15  ;;  %307 = vmatpush.xpose.msrb.mxu0 %v116_v32  ;;  %v95_v15 = vand.u32 4294901760, %v94_v25 }
  0x52   :  { %292 = vmatmul.f32.vlgmr.msra.gmra.mxu3 %v95_v15 }
  0x54   :  { %368 = vmatpush.xpose.msrb.mxu1 %v482_v16  ;;  %311 = vmatpush.xpose.msrb.mxu0 %v122_v41  ;;  %v96_v16 = vsub.f32 %v94_v25, %v95_v15 }
  0x58   :  { %370 = vmatpush.xpose.msrb.mxu1 %v484_v17  ;;  %315 = vmatpush.xpose.msrb.mxu0 %v128_v49  ;;  %v97_v17 = vand.u32 4294901760, %v96_v16 }
  0x5a   :  { %98 = vmatmul.f32.vlgmr.msra.gmra.mxu0 %v97_v17 }
  0x5c   :  { %372 = vmatpush.xpose.msrb.mxu1 %v493_v22  ;;  %319 = vmatpush.xpose.msrb.mxu0 %v134_v52 }
  0x60   :  { %374 = vmatpush.xpose.msrb.mxu1 %v505_v27  ;;  %323 = vmatpush.xpose.msrb.mxu0 %v140_v61 }
  0x64   :  { %376 = vmatpush.xpose.msrb.mxu1 %v523_v36  ;;  %327 = vmatpush.xpose.msrb.mxu0 %v146_v8 }
  0x68   :  { %378 = vmatpush.xpose.msrb.mxu1 %v538_v44  ;;  %331 = vmatpush.xpose.msrb.mxu0 %v152_v24 }
  0x6c   :  { %380 = vmatpush.xpose.msrb.mxu1 %v554_v53  ;;  %335 = vmatpush.xpose.msrb.mxu0 %v158_v38 }
  0x70   :  { %382 = vmatpush.xpose.msrb.mxu1 %v573_v0  ;;  %339 = vmatpush.xpose.msrb.mxu0 %v164_v43 }
  0x74   :  { %384 = vmatpush.xpose.msrb.mxu1 %v588_v9  ;;  %343 = vmatpush.xpose.msrb.mxu0 %v170_v58 }
  0x78   :  { %386 = vmatpush.xpose.msrb.mxu1 %v598_v12  ;;  %347 = vmatpush.xpose.msrb.mxu0 %v176_v4 }
  0x7c   :  { %388 = vmatpush.xpose.msrb.mxu1 %v613_v30  ;;  %351 = vmatpush.xpose.msrb.mxu0 %v182_v18 }
  0x80   :  { %390 = vmatpush.xpose.msrb.mxu1 %v629_v46  ;;  %355 = vmatpush.xpose.msrb.mxu0 %v188_v37 }
  0x84   :  { %392 = vmatpush.xpose.msrb.mxu1 %v651_v62  ;;  %359 = vmatpush.xpose.msrb.mxu0 %v194_v50 }
  0x87   :  { %361 = vmatmul.f32.vlgmr.msrb.gmra.mxu0 %v93_v21 }
  0x88   :  { %394 = vmatpush.xpose.msrb.mxu1 %v660_v6 }
  0x8c   :  { %396 = vmatpush.xpose.msrb.mxu1 %v672_v19 }
  0x8f   :  { %398 = vmatmul.f32.vlgmr.msrb.gmra.mxu1 %v93_v21 }
  0xcc   :  { %v200_v22 = vpop.f32.mrf.mxu1 }
  0xcd   :  { %v254_v27 = vpop.f32.mrf.mxu2 }
  0xd5   :  { %v293_v33 = vpop.f32.mrf.mxu3 }
  0xd7   :  { %v99_v23 = vpop.f32.mrf.mxu0 }
  0xd8   :  { %v201_v26 = vadd.f32 %v200_v22, %v99_v23 }
  0xda   :  { %v255_v32 = vadd.f32 %v254_v27, %v201_v26 }
  0xdc   :  { %v294_v36 = vadd.f32 %v293_v33, %v255_v32 }
 0x104   :  { %v362_v41 = vpop.f32.mrf.mxu0 }
 0x105   :  { %v363_v42 = vadd.f32 %v362_v41, %v294_v36 }
 0x10c   :  { %v399_v44 = vpop.f32.mrf.mxu1 }
 0x10d   :  { %v400_v45 = vadd.f32 %v399_v44, %v363_v42 }
 0x10f   :  { %402 = vst [vmem:[#allocation2] sm:$0xff] %v400_v45 }
 0x110   :  { %413 = dma.vmem_to_hbm [thread:$0]  %s409_s14, 128, %s411_s17, [#allocation3]  }
 0x111   :  { %444 = dma.done.wait [#allocation3], 128  }
 0x112   :  { %445 = vsyncadd [#allocation3], 4294967168 }
 0x113   :  { %418 = vsyncpa [#allocation3], 1 }

</bundles_post_ra>
